<compile_context>
chip_gen: v7x
topology: tpu7x:2x2x1
jax: 0.10.0
libtpu: 0.0.40
codegen_flags: <defaults>
</compile_context>

<pallas_src>
import functools
import math

import jax
import jax.numpy as jnp
from jax import lax
from jax.experimental import pallas as pl
from jax.experimental.pallas import tpu as pltpu


def _sparse_attn_kernel(q_ref, k_ref, v_ref, o_ref, *, scale, offsets):
    # Blocks: q (1, L, H, E), k (1, L, H, E), v (1, L, H, D), o (1, L, H, D)
    q = q_ref[0].astype(jnp.float32) * scale          # scale folded into Q
    k = k_ref[0].astype(jnp.float32)
    v = v_ref[0].astype(jnp.float32)
    L, H, E = q.shape
    D = v.shape[-1]

    # Row index (query position), kept 3-D so every intermediate stays in the
    # same (sublane=H, lane=feature) layout (no 2D<->3D relayouts).
    row = lax.broadcasted_iota(jnp.int32, (L, H, 1), 0)

    # Per-diagonal raw scores: scores_o[l, h] = sum_e q[l,h,e] * k[l-o, h, e]
    # Only the statically-known allowed offsets are ever touched.
    scores = []
    v_shift = []
    for o in offsets:
        if o == 0:
            k_o, v_o = k, v
        else:
            k_o = jnp.concatenate(
                [jnp.zeros((o, H, E), jnp.float32), k[: L - o]], axis=0)
            v_o = jnp.concatenate(
                [jnp.zeros((o, H, D), jnp.float32), v[: L - o]], axis=0)
        s_o = jnp.sum(q * k_o, axis=-1, keepdims=True)          # (L, H, 1)
        if o > 0:
            s_o = jnp.where(row >= o, s_o, -jnp.inf)            # j = l-o must be >= 0
        scores.append(s_o)
        v_shift.append(v_o)

    # Numerically-stable softmax over the tiny static diagonal set.
    # The o == 0 diagonal is always valid (L >= 2 guaranteed by the wrapper),
    # so the running max is finite for every row -> no NaNs.
    m = scores[0]
    for s_o in scores[1:]:
        m = jnp.maximum(m, s_o)

    exps = [jnp.exp(s_o - m) for s_o in scores]

    denom = exps[0]
    acc = exps[0] * v_shift[0]                                  # (L, H, D)
    for e_o, v_o in zip(exps[1:], v_shift[1:]):
        denom = denom + e_o
        acc = acc + e_o * v_o

    # Deferred normalization; denom is only (L, H, 1).
    # TODO(synk): nn.Dropout(0.1) omitted — eval / inference semantics (identity).
    inv = pl.reciprocal(denom)
    o_ref[0] = (acc * inv).astype(o_ref.dtype)


def _round_up(x, m):
    return (x + m - 1) // m * m


def _vmem_limit_bytes(L, H, E, D, num_diags, itemsize):
    # Pallas double-buffers each pipelined block; in-kernel f32 intermediates
    # hold one shifted K/V copy per allowed diagonal plus the accumulator.
    tile_qk = L * _round_up(H, 8) * _round_up(E, 128)
    tile_vo = L * _round_up(H, 8) * _round_up(D, 128)
    blocks = 2 * itemsize * (2 * tile_qk + 2 * tile_vo)
    interm = 4 * (num_diags + 1) * (tile_qk + tile_vo)
    est = blocks + interm + (4 << 20)
    return int(min(max(est, 16 << 20), 64 << 20))


def sparse_attention(queries, keys, values, attn_mask=None, scale=None):
    """queries (B,L,H,E), keys (B,S,H,E), values (B,S,H,D) -> ((B,L,H,D), None).

    `attn_mask` is ignored, exactly like the PyTorch module (it rebuilds its
    own sparse mask internally).
    """
    del attn_mask
    B, L, H, E = queries.shape
    _, S, _, _ = keys.shape
    _, Sv, _, D = values.shape
    if S != L or Sv != L:
        # The PyTorch module's mask construction (L x L) implies S == L.
        raise ValueError(f"SparseAttention requires S == L, got L={L}, S={S}")
    if L < 2:
        # L == 1 masks every position (reference produces NaN rows).
        raise ValueError("SparseAttention requires L >= 2")
    if scale is None:
        scale = 1.0 / math.sqrt(E)

    # Allowed diagonals: d = l - s + 1 in {1, 4, 16, ...}, d < L  ->  offsets d-1.
    offsets = []
    d = 1
    while d < L:
        offsets.append(d - 1)
        d *= 4
    offsets = tuple(offsets)

    kernel = functools.partial(
        _sparse_attn_kernel, scale=float(scale), offsets=offsets)

    vmem_limit = _vmem_limit_bytes(
        L, H, E, D, len(offsets), jnp.dtype(queries.dtype).itemsize)

    out = pl.pallas_call(
        kernel,
        out_shape=jax.ShapeDtypeStruct((B, L, H, D), queries.dtype),
        grid=(B,),
        in_specs=[
            pl.BlockSpec((1, L, H, E), lambda b: (b, 0, 0, 0)),
            pl.BlockSpec((1, L, H, E), lambda b: (b, 0, 0, 0)),
            pl.BlockSpec((1, L, H, D), lambda b: (b, 0, 0, 0)),
        ],
        out_specs=pl.BlockSpec((1, L, H, D), lambda b: (b, 0, 0, 0)),
        compiler_params=pltpu.CompilerParams(
            dimension_semantics=("parallel",),
            vmem_limit_bytes=vmem_limit),
    )(queries, keys, values)

    return out, None


def _reference(queries, keys, values, scale=None):
    """Pure-JAX mirror of the PyTorch forward (eval mode), for verification."""
    B, L, H, E = queries.shape
    if scale is None:
        scale = 1.0 / math.sqrt(E)
    scores = jnp.einsum('blhe,bshe->bhls', queries, keys)
    i = jnp.arange(L)[:, None]
    j = jnp.arange(L)[None, :]
    d = i - j + 1
    allowed = jnp.zeros((L, L), dtype=bool)
    dd = 1
    while dd < L:                       # mirrors: a[:, :, u] = False; u *= 4
        allowed = allowed | (d == dd)
        dd *= 4
    scores = jnp.where(allowed[None, None], scores, -jnp.inf)
    A = jax.nn.softmax(scale * scores, axis=-1)
    return jnp.einsum('bhls,bshd->blhd', A, values)


if __name__ == "__main__":
    B, L, H, E, D = 2, 8, 2, 32, 32     # S == L (the module's mask requires it)
    key = jax.random.PRNGKey(0)
    kq, kk, kv = jax.random.split(key, 3)
    queries = jax.random.normal(kq, (B, L, H, E), dtype=jnp.float32)
    keys_ = jax.random.normal(kk, (B, L, H, E), dtype=jnp.float32)
    values = jax.random.normal(kv, (B, L, H, D), dtype=jnp.float32)

    out, attn = sparse_attention(queries, keys_, values)
    out = jax.block_until_ready(out)

    ref = _reference(queries, keys_, values)
    assert out.shape == (B, L, H, D)
    assert attn is None
    assert jnp.allclose(out, ref, atol=2e-5, rtol=2e-5), "mismatch vs reference"

    print("KERNEL_OK")
</pallas_src>

<mosaic_0001>
module attributes {stable_mosaic.version = 11 : i64} {
  func.func @_sparse_attn_kernel(%arg0: i32, %arg1: memref<1x8x2x32xf32, #tpu.memory_space<vmem>>, %arg2: memref<1x8x2x32xf32, #tpu.memory_space<vmem>>, %arg3: memref<1x8x2x32xf32, #tpu.memory_space<vmem>>, %arg4: memref<1x8x2x32xf32, #tpu.memory_space<vmem>>) attributes {dimension_semantics = [#tpu.dimension_semantics<parallel>], iteration_bounds = array<i64: 2>, scalar_prefetch = 0 : i64, scratch_operands = 0 : i64, tpu.core_type = #tpu.core_type<tc>, window_params = [{transform_indices = @transform_0, window_bounds = array<i64: 1, 8, 2, 32>}, {transform_indices = @transform_1, window_bounds = array<i64: 1, 8, 2, 32>}, {transform_indices = @transform_2, window_bounds = array<i64: 1, 8, 2, 32>}, {transform_indices = @transform_3, window_bounds = array<i64: 1, 8, 2, 32>}]} {
    %c0 = arith.constant 0 : index
    %c0_0 = arith.constant 0 : index
    %c0_1 = arith.constant 0 : index
    %c0_2 = arith.constant 0 : index
    %0 = vector.load %arg1[%c0, %c0_0, %c0_1, %c0_2] : memref<1x8x2x32xf32, #tpu.memory_space<vmem>>, vector<1x8x2x32xf32>
    %1 = vector.shape_cast %0 : vector<1x8x2x32xf32> to vector<8x2x32xf32>
    %cst = arith.constant 0.176776692 : f32
    %2 = vector.broadcast %cst : f32 to vector<8x2x32xf32>
    %3 = arith.mulf %1, %2 : vector<8x2x32xf32>
    %c0_3 = arith.constant 0 : index
    %c0_4 = arith.constant 0 : index
    %c0_5 = arith.constant 0 : index
    %c0_6 = arith.constant 0 : index
    %4 = vector.load %arg2[%c0_3, %c0_4, %c0_5, %c0_6] : memref<1x8x2x32xf32, #tpu.memory_space<vmem>>, vector<1x8x2x32xf32>
    %5 = vector.shape_cast %4 : vector<1x8x2x32xf32> to vector<8x2x32xf32>
    %c0_7 = arith.constant 0 : index
    %c0_8 = arith.constant 0 : index
    %c0_9 = arith.constant 0 : index
    %c0_10 = arith.constant 0 : index
    %6 = vector.load %arg3[%c0_7, %c0_8, %c0_9, %c0_10] : memref<1x8x2x32xf32, #tpu.memory_space<vmem>>, vector<1x8x2x32xf32>
    %7 = vector.shape_cast %6 : vector<1x8x2x32xf32> to vector<8x2x32xf32>
    %8 = tpu.iota {dimensions = array<i32: 0>} : vector<8x2x1xi32>
    %9 = arith.mulf %3, %5 : vector<8x2x32xf32>
    %cst_11 = arith.constant dense<0.000000e+00> : vector<8x2xf32>
    %10 = vector.multi_reduction <add>, %9, %cst_11 [2] : vector<8x2x32xf32> to vector<8x2xf32>
    %11 = vector.shape_cast %10 : vector<8x2xf32> to vector<8x2x1xf32>
    %cst_12 = arith.constant 0.000000e+00 : f32
    %12 = vector.broadcast %cst_12 : f32 to vector<3x2x32xf32>
    %13 = vector.extract_strided_slice %5 {offsets = [0, 0, 0], sizes = [5, 2, 32], strides = [1, 1, 1]} : vector<8x2x32xf32> to vector<5x2x32xf32>
    %14 = tpu.concatenate %12, %13 in 0 : vector<3x2x32xf32>, vector<5x2x32xf32> -> vector<8x2x32xf32>
    %cst_13 = arith.constant 0.000000e+00 : f32
    %15 = vector.broadcast %cst_13 : f32 to vector<3x2x32xf32>
    %16 = vector.extract_strided_slice %7 {offsets = [0, 0, 0], sizes = [5, 2, 32], strides = [1, 1, 1]} : vector<8x2x32xf32> to vector<5x2x32xf32>
    %17 = tpu.concatenate %15, %16 in 0 : vector<3x2x32xf32>, vector<5x2x32xf32> -> vector<8x2x32xf32>
    %18 = arith.mulf %3, %14 : vector<8x2x32xf32>
    %cst_14 = arith.constant dense<0.000000e+00> : vector<8x2xf32>
    %19 = vector.multi_reduction <add>, %18, %cst_14 [2] : vector<8x2x32xf32> to vector<8x2xf32>
    %20 = vector.shape_cast %19 : vector<8x2xf32> to vector<8x2x1xf32>
    %c3_i32 = arith.constant 3 : i32
    %21 = vector.broadcast %c3_i32 : i32 to vector<8x2x1xi32>
    %22 = arith.cmpi sge, %8, %21 : vector<8x2x1xi32>
    %cst_15 = arith.constant 0xFF800000 : f32
    %23 = vector.broadcast %cst_15 : f32 to vector<8x2x1xf32>
    %24 = arith.select %22, %20, %23 : vector<8x2x1xi1>, vector<8x2x1xf32>
    %25 = arith.maximumf %11, %24 : vector<8x2x1xf32>
    %26 = arith.subf %11, %25 : vector<8x2x1xf32>
    %27 = math.exp %26 : vector<8x2x1xf32>
    %28 = arith.subf %24, %25 : vector<8x2x1xf32>
    %29 = math.exp %28 : vector<8x2x1xf32>
    %30 = vector.broadcast %27 : vector<8x2x1xf32> to vector<8x2x32xf32>
    %31 = arith.mulf %30, %7 : vector<8x2x32xf32>
    %32 = arith.addf %27, %29 : vector<8x2x1xf32>
    %33 = vector.broadcast %29 : vector<8x2x1xf32> to vector<8x2x32xf32>
    %34 = arith.mulf %33, %17 : vector<8x2x32xf32>
    %35 = arith.addf %31, %34 : vector<8x2x32xf32>
    %36 = tpu.reciprocal %32 : vector<8x2x1xf32> -> vector<8x2x1xf32>
    %37 = vector.broadcast %36 : vector<8x2x1xf32> to vector<8x2x32xf32>
    %38 = arith.mulf %35, %37 : vector<8x2x32xf32>
    %c0_16 = arith.constant 0 : index
    %c0_17 = arith.constant 0 : index
    %c0_18 = arith.constant 0 : index
    %c0_19 = arith.constant 0 : index
    %39 = vector.load %arg4[%c0_16, %c0_17, %c0_18, %c0_19] : memref<1x8x2x32xf32, #tpu.memory_space<vmem>>, vector<1x8x2x32xf32>
    %40 = vector.shape_cast %39 : vector<1x8x2x32xf32> to vector<8x2x32xf32>
    %41 = vector.shape_cast %38 : vector<8x2x32xf32> to vector<1x8x2x32xf32>
    tpu.vector_store %arg4[%c0_16, %c0_17, %c0_18, %c0_19], %41 {strides = array<i32>} : memref<1x8x2x32xf32, #tpu.memory_space<vmem>>, vector<1x8x2x32xf32>,
    return
  }
  func.func @transform_0(%arg0: i32) -> (i32, i32, i32, i32) {
    %c0_i32 = arith.constant 0 : i32
    %c0_i32_0 = arith.constant 0 : i32
    %c0_i32_1 = arith.constant 0 : i32
    %c0_i32_2 = arith.constant 0 : i32
    return %arg0, %c0_i32, %c0_i32_0, %c0_i32_1 : i32, i32, i32, i32
  }
  func.func @transform_1(%arg0: i32) -> (i32, i32, i32, i32) {
    %c0_i32 = arith.constant 0 : i32
    %c0_i32_0 = arith.constant 0 : i32
    %c0_i32_1 = arith.constant 0 : i32
    %c0_i32_2 = arith.constant 0 : i32
    return %arg0, %c0_i32, %c0_i32_0, %c0_i32_1 : i32, i32, i32, i32
  }
  func.func @transform_2(%arg0: i32) -> (i32, i32, i32, i32) {
    %c0_i32 = arith.constant 0 : i32
    %c0_i32_0 = arith.constant 0 : i32
    %c0_i32_1 = arith.constant 0 : i32
    %c0_i32_2 = arith.constant 0 : i32
    return %arg0, %c0_i32, %c0_i32_0, %c0_i32_1 : i32, i32, i32, i32
  }
  func.func @transform_3(%arg0: i32) -> (i32, i32, i32, i32) {
    %c0_i32 = arith.constant 0 : i32
    %c0_i32_0 = arith.constant 0 : i32
    %c0_i32_1 = arith.constant 0 : i32
    %c0_i32_2 = arith.constant 0 : i32
    return %arg0, %c0_i32, %c0_i32_0, %c0_i32_1 : i32, i32, i32, i32
  }
}

</mosaic_0001>

<bundles_post_ra>
// kernel: tpu_custom_call.1
= control target key start
LH: loop header
LB: loop body
LE: loop exit
PB: predicated region body
PF: predicated region fallthrough
CT: control target
= control target key end

     0   :  { %s1264_s0 = inlined_call_operand.hbm [shape: f32[2,8,2,32], index: 0, kind: input, shape index: {}]   ;;  %s1265_s1 = inlined_call_operand.hbm [shape: f32[2,8,2,32], index: 1, kind: input, shape index: {}]   ;;  %s1266_s2 = inlined_call_operand.hbm [shape: f32[2,8,2,32], index: 2, kind: input, shape index: {}]   ;;  %s1267_s3 = inlined_call_operand.hbm [shape: f32[2,8,2,32], index: 3, kind: output, shape index: {}]  }
   0x1   :  { %1274 = sst [smem:[#allocation12_spill]] %s1264_s0 }
   0x2   :  { %8 = vsyncpa [#allocation3], 0 }
   0x3   :  { %10 = vsyncpa [#allocation3 + $0x1], 0 }
   0x4   :  { %11 = vsyncpa [#allocation6], 0 }
   0x5   :  { %13 = vsyncpa [#allocation6 + $0x1], 0 }
   0x6   :  { %14 = vsyncpa [#allocation4], 0 }
   0x7   :  { %16 = vsyncpa [#allocation4 + $0x1], 0  ;;  %s937_s12 = smov 0   ;;  %s939_s13 = smov 0  }
   0x8   :  { %s941_s14 = smov 0   ;;  %s943_s15 = smov 0  }
   0x9 LB: > { %s958_s16 = sadd.s32 4294967295, %s907_s15   ;;  %s613_s17 = sadd.s32 4294967294, %s907_s15   ;;  %s907_s15 = sphi %s943_s15, %s1293_s15   ;;  %s903_s14 = sphi %s941_s14, %s1292_s14   ;;  %s899_s13 = sphi %s939_s13, %s1291_s13   ;;  %s895_s12 = sphi %s937_s12, %s1290_s12  }
   0xa   : > { %s962_s18 = sadd.s32 1, %s907_s15   ;;  %s29_s19 = sadd.s32 1, %s903_s14 }
   0xb   : > { %s26_s20 = ssub.s32 %s907_s15, %s962_s18  ;;  %p36_p0 = scmp.ne.s32.totalorder %s903_s14, %s899_s13 }
   0xc   : > { %p27_p1 = scmp.eq.s32.totalorder %s26_s20, 0  ;;  %p37_p2 = scmp.eq.s32.totalorder %s907_s15, 0 }
   0xd   : > { %p42_p3 = scmp.ne.s32.totalorder %s899_s13, %s895_s12  ;;  %p43_p4 = scmp.eq.s32.totalorder %s958_s16, 0 }
   0xe   : > { %s974_s21 = scalar_select %p27_p1, %s903_s14, %s29_s19  }
   0xf   : > { %p38_p5 = por %p37_p2, %p36_p0  ;;  %p976_p6 = por %p43_p4, %p42_p3 }
  0x10   : > { %p118_p7 = scmp.eq.s32.totalorder %s958_s16, 1  ;;  %p124_p8 = scmp.eq.s32.totalorder %s613_s17, 1 }
  0x11   : > { %s1275_s22 = scalar_select %p976_p6, 1, 0 }
  0x12   : > { %p661_p10 = scmp.lt.s32.totalorder %s907_s15, 2  ;;  %p983_p11 = por %p118_p7, %p36_p0 }
  0x13   : > { %p987_p12 = por %p124_p8, %p42_p3  ;;  %s144_s25 = sand.u32 1, %s903_s14  }
  0x14   : > { %s1276_s23 = scalar_select %p983_p11, 1, 0 }
  0x15   : > { %s1277_s24 = scalar_select %p987_p12, 1, 0 }
  0x16   : > { %s993_s26 = sshll.u32 %s907_s15, 8  ;;  %s997_s27 = sshll.u32 %s144_s25, 4 }
  0x17   : > { %p999_p13 = pnand %p661_p10, %p38_p5  ;;  %s165_s29 = sand.u32 1, %s907_s15  }
  0x18   : > { %s1008_s5 = scalar_lea.hbm %s1265_s1, %s993_s26  ;;  %s169_s6 = scalar_lea.vmem [#allocation5], %s997_s27 }
  0x19   : > { %s176_s7 = sshll.u32 %s169_s6, 4  ;;  %s1014_s8 = scalar_lea.sflag [#allocation6], %s165_s29  ;;  %s1011_s7 = int_to_ptr.vmem [resolvable:$true] %s176_s7 }
  0x1a   : > { %s747_s9 = scalar_lea.hbm %s1008_s5, 256  ;;  %p1020_p2 = pneg %p999_p13 }
  0x1b   : > { %p748_p1 = scmp.ne.s32.totalorder %s1008_s5, %s747_s9  ;;  %s752_s19 = scalar_lea.hbm %s1265_s1, 512 }
  0x1c   : > { %p753_p5 = scmp.lt.u32.totalorder %s1008_s5, %s1265_s1  ;;  %p754_p7 = scmp.lt.u32.totalorder %s752_s19, %s747_s9 }
  0x1d   : > { %p750_p3 = pnand %p1020_p2, %p748_p1  ;;  %p756_p10 = scmp.lt.u32.totalorder %s747_s9, %s1008_s5 }
  0x1e   : > { %p755_p8 = por %p754_p7, %p753_p5 }
  0x1f   : > { %p751_p4 = pneg %p750_p3 }
  0x20   : > { %p757_p9 = por %p756_p10, %p755_p8 }
  0x22   : > { %p758_p0 = pnand %p757_p9, %p751_p4 }
  0x24   : > { %761 = shalt.err (!%p758_p0)
}
  0x25   : > { %s762_s29 = scalar_lea.vmem %s1011_s7, 256  ;;  %s909_s4 = smov [#allocation5]  }
  0x26   : > { %p763_p1 = scmp.ne.s32.totalorder %s1011_s7, %s762_s29  ;;  %s767_s6 = sshll.u32 %s909_s4, 4  ;;  %s768_s6 = int_to_ptr.vmem [resolvable:$false] %s767_s6 }
  0x27   : > { %s769_s11 = scalar_lea.vmem %s768_s6, 512  ;;  %p770_p11 = scmp.lt.s32.totalorder %s1011_s7, %s768_s6 }
  0x28   : > { %p765_p3 = pnand %p763_p1, %p1020_p2  ;;  %p771_p6 = scmp.lt.s32.totalorder %s769_s11, %s762_s29 }
  0x2a   : > { %p766_p12 = pneg %p765_p3  ;;  %p772_p5 = por %p771_p6, %p770_p11 }
  0x2c   : > { %p773_p7 = pnand %p772_p5, %p766_p12 }
  0x2e   : > { %776 = shalt.err (!%p773_p7)
}
  0x2f   : > { %s1270_s9 = smov 32   ;;  %s1272_s17 = smov 2  }
  0x30   : > { %653 = dma.hbm_to_vmem [thread:$0]  (!%p999_p13), %s1008_s5, 256, %s1011_s7, %s1014_s8, %s1270_s9, %s1270_s9, %s1272_s17  }
  0x31   : > { %p205_p6 = scmp.lt.s32.totalorder %s907_s15, 3  ;;  %s1280_s0 = sld [smem:[#allocation12_spill]] }
  0x32   : > { %p1281_p9 = scmp.ge.s32.totalorder %s907_s15, 1  ;;  %s148_s4 = scalar_lea.vmem [#allocation2], %s997_s27 }
  0x33   : > { %s155_s6 = sshll.u32 %s148_s4, 4  ;;  %s1065_s5 = scalar_lea.sflag [#allocation3], %s144_s25  ;;  %s1061_s6 = int_to_ptr.vmem [resolvable:$true] %s155_s6 }
  0x34   : > { %p1056_p11 = pnand %p1281_p9, %p205_p6 }
  0x36   : > { %s1282_s29 = scalar_select %p1056_p11, 1, 0 }
  0x37   : > { %s1052_s30 = scalar_lea.hbm %s1280_s0, %s993_s26  ;;  %s782_s20 = scalar_lea.hbm %s1280_s0, 512 }
  0x38   : > { %s777_s7 = scalar_lea.hbm %s1052_s30, 256  ;;  %p783_p8 = scmp.lt.u32.totalorder %s1052_s30, %s1280_s0 }
  0x39   : > { %p778_p12 = scmp.ne.s32.totalorder %s1052_s30, %s777_s7  ;;  %p784_p10 = scmp.lt.u32.totalorder %s782_s20, %s777_s7 }
  0x3a   : > { %p786_p3 = scmp.lt.u32.totalorder %s777_s7, %s1052_s30 }
  0x3b   : > { %p780_p0 = pnand %p778_p12, %p1020_p2  ;;  %p785_p1 = por %p784_p10, %p783_p8 }
  0x3d   : > { %p781_p4 = pneg %p780_p0  ;;  %p787_p5 = por %p786_p3, %p785_p1 }
  0x3f   : > { %p788_p7 = pnand %p787_p5, %p781_p4 }
  0x41   : > { %791 = shalt.err (!%p788_p7)
}
  0x42   : > { %s792_s25 = scalar_lea.vmem %s1061_s6, 256  ;;  %s912_s4 = smov [#allocation2]  }
  0x43   : > { %p793_p6 = scmp.ne.s32.totalorder %s1061_s6, %s792_s25  ;;  %s797_s11 = sshll.u32 %s912_s4, 4  ;;  %s798_s11 = int_to_ptr.vmem [resolvable:$false] %s797_s11 }
  0x44   : > { %s799_s9 = scalar_lea.vmem %s798_s11, 512  ;;  %p800_p0 = scmp.lt.s32.totalorder %s1061_s6, %s798_s11 }
  0x45   : > { %p795_p9 = pnand %p793_p6, %p1020_p2  ;;  %p801_p11 = scmp.lt.s32.totalorder %s799_s9, %s792_s25 }
  0x47   : > { %p796_p12 = pneg %p795_p9  ;;  %p802_p8 = por %p801_p11, %p800_p0 }
  0x49   : > { %p803_p10 = pnand %p802_p8, %p796_p12 }
  0x4b   : > { %806 = shalt.err (!%p803_p10)
}
  0x4c   : > { %s1283_s17 = smov 2   ;;  %s1284_s7 = smov 32  }
  0x4d   : > { %650 = dma.hbm_to_vmem [thread:$0]  (!%p999_p13), %s1052_s30, 256, %s1061_s6, %s1065_s5, %s1284_s7, %s1284_s7, %s1283_s17  }
  0x4e   : > { %s1096_s4 = scalar_lea.hbm %s1266_s2, %s993_s26  ;;  %s190_s25 = scalar_lea.vmem [#allocation7], %s997_s27 }
  0x4f   : > { %s197_s11 = sshll.u32 %s190_s25, 4  ;;  %s807_s9 = scalar_lea.hbm %s1096_s4, 256  ;;  %s1099_s11 = int_to_ptr.vmem [resolvable:$true] %s197_s11 }
  0x50   : > { %p808_p11 = scmp.ne.s32.totalorder %s1096_s4, %s807_s9  ;;  %s812_s6 = scalar_lea.hbm %s1266_s2, 512 }
  0x51   : > { %p813_p3 = scmp.lt.u32.totalorder %s1096_s4, %s1266_s2  ;;  %p814_p5 = scmp.lt.u32.totalorder %s812_s6, %s807_s9 }
  0x52   : > { %p810_p4 = pnand %p808_p11, %p1020_p2  ;;  %p816_p6 = scmp.lt.u32.totalorder %s807_s9, %s1096_s4 }
  0x53   : > { %p815_p7 = por %p814_p5, %p813_p3 }
  0x54   : > { %p811_p1 = pneg %p810_p4 }
  0x55   : > { %p817_p9 = por %p816_p6, %p815_p7 }
  0x57   : > { %p818_p12 = pnand %p817_p9, %p811_p1 }
  0x59   : > { %821 = shalt.err (!%p818_p12)
}
  0x5a   : > { %s822_s27 = scalar_lea.vmem %s1099_s11, 256  ;;  %s913_s0 = smov [#allocation7]  }
  0x5b   : > { %p823_p0 = scmp.ne.s32.totalorder %s1099_s11, %s822_s27  ;;  %s827_s19 = sshll.u32 %s913_s0, 4  ;;  %s828_s19 = int_to_ptr.vmem [resolvable:$false] %s827_s19 }
  0x5c   : > { %s829_s20 = scalar_lea.vmem %s828_s19, 512  ;;  %p830_p11 = scmp.lt.s32.totalorder %s1099_s11, %s828_s19 }
  0x5d   : > { %p825_p8 = pnand %p823_p0, %p1020_p2  ;;  %p831_p4 = scmp.lt.s32.totalorder %s829_s20, %s822_s27 }
  0x5f   : > { %p826_p10 = pneg %p825_p8  ;;  %p832_p3 = por %p831_p4, %p830_p11 }
  0x61   : > { %p833_p5 = pnand %p832_p3, %p826_p10 }
  0x63   : > { %836 = shalt.err (!%p833_p5)
}
  0x64   : > { %656 = dma.hbm_to_vmem [thread:$0]  (!%p999_p13), %s1096_s4, 256, %s1099_s11, %s1014_s8, %s1284_s7, %s1284_s7, %s1283_s17  }
  0x65   : > { %p1285_p2 = scmp.ne.s32.totalorder %s1282_s29, 0 }
  0x66   : > { %s1129_s10 = sand.u32 (!%p1285_p2), 1, %s899_s13   ;;  %p1286_p1 = scmp.ne.s32.totalorder (!%p1285_p2), %s1275_s22, 0 }
  0x67   : > { %209 = sbr.rel (%p1285_p2) target bundleno = 336 (0x150), region = 32  ;;  %s1132_s25 = sshll.u32 (!%p1285_p2), %s1129_s10, 4 }
  0x68   : > { %s212_s28 = scalar_lea.sflag (!%p1285_p2), [#allocation3], %s1129_s10  ;;  %s1136_s9 = scalar_lea.vmem (!%p1285_p2), [#allocation2], %s1132_s25 }
  0x6e   : > { %882 = dma.done.wait (%p1286_p1), %s212_s28, 256  }
  0x6f   : > { %884 = vsyncadd (%p1286_p1), %s212_s28, 4294967040  ;;  %s220_s8 = sand.u32 1, %s958_s16   ;;  %s1144_s17 = scalar_lea.vmem [#allocation5], %s1132_s25 }
  0x70   : > { %s221_s29 = scalar_lea.sflag [#allocation6], %s220_s8 }
  0x71   : > { %886 = dma.done.wait (%p1286_p1), %s221_s29, 512  }
  0x72   : > { %888 = vsyncadd (%p1286_p1), %s221_s29, 4294966784  ;;  %vm306_vm0 = vcmask 254976   ;;  %v271_v0 = vld [vmem:[%s1136_s9 + $0xa] sm:$0x3]  ;;  %v269_v2 = vld [vmem:[%s1136_s9 + $0x6] sm:$0x3] }
  0x73   : > { %v287_v1 = vld [vmem:[%s1144_s17 + $0xa] sm:$0x3]  ;;  %v279_v3 = vmul.f32 0.17677669, %v271_v0  ;;  %v277_v4 = vmul.f32 0.17677669, %v269_v2 }
  0x74   : > { %v285_v5 = vld [vmem:[%s1144_s17 + $0x6] sm:$0x3]  ;;  %v272_v6 = vld [vmem:[%s1136_s9 + $0xc] sm:$0x3]  ;;  %v270_v8 = vld [vmem:[%s1136_s9 + $0x8] sm:$0x3] }
  0x75   : > { %v288_v7 = vld [vmem:[%s1144_s17 + $0xc] sm:$0x3]  ;;  %v303_v9 = vmul.f32 %v287_v1, %v279_v3  ;;  %v301_v10 = vmul.f32 %v285_v5, %v277_v4  ;;  %v280_v11 = vmul.f32 0.17677669, %v272_v6  ;;  %v278_v12 = vmul.f32 0.17677669, %v270_v8 }
  0x76   : > { %v286_v13 = vld [vmem:[%s1144_s17 + $0x8] sm:$0x3]  ;;  %v282_v14 = vld [vmem:[%s1144_s17] sm:$0x3]  ;;  %v273_v15 = vld [vmem:[%s1136_s9 + $0xe] sm:$0x3] }
  0x77   : > { %v322_v16 = vsel %vm306_vm0, %v303_v9, 0.0  ;;  %v316_v17 = vsel %vm306_vm0, %v301_v10, 0.0  ;;  %v304_v18 = vmul.f32 %v288_v7, %v280_v11  ;;  %v302_v19 = vmul.f32 %v286_v13, %v278_v12  ;;  %v289_v20 = vld [vmem:[%s1144_s17 + $0xe] sm:$0x3]  ;;  %v284_v26 = vld [vmem:[%s1144_s17 + $0x4] sm:$0x3] }
  0x78   : > { %323 = vadd.xlane.f32.xlu1 %v322_v16  ;;  %317 = vadd.xlane.f32.xlu0 %v316_v17  ;;  %v281_v21 = vmul.f32 0.17677669, %v273_v15  ;;  %v334_v24 = vmul.f32 %v282_v14, %v277_v4  ;;  %v283_v27 = vld [vmem:[%s1144_s17 + $0x2] sm:$0x3]  ;;  %v336_v30 = vmul.f32 %v284_v26, %v279_v3  ;;  %v266_v33 = vld [vmem:[%s1136_s9] sm:$0x3]  ;;  %v337_v34 = vmul.f32 %v285_v5, %v280_v11 }
  0x79   : > { %v325_v22 = vsel %vm306_vm0, %v304_v18, 0.0  ;;  %v319_v23 = vsel %vm306_vm0, %v302_v19, 0.0  ;;  %v335_v31 = vmul.f32 %v283_v27, %v278_v12  ;;  %v267_v32 = vld [vmem:[%s1136_s9 + $0x2] sm:$0x3]  ;;  %v274_v39 = vmul.f32 0.17677669, %v266_v33 }
  0x7a   : > { %v305_v25 = vmul.f32 %v289_v20, %v281_v21  ;;  %v348_v28 = vsel %vm306_vm0, %v334_v24, 0.0  ;;  %v275_v35 = vmul.f32 0.17677669, %v267_v32  ;;  %v354_v36 = vsel %vm306_vm0, %v336_v30, 0.0  ;;  %v268_v40 = vld [vmem:[%s1136_s9 + $0x4] sm:$0x3] }
  0x7b   : > { %v351_v37 = vsel %vm306_vm0, %v335_v31, 0.0  ;;  %v338_v38 = vmul.f32 %v286_v13, %v281_v21  ;;  %v357_v41 = vsel %vm306_vm0, %v337_v34, 0.0  ;;  %v298_v44 = vmul.f32 %v282_v14, %v274_v39  ;;  %s1180_s22 = scalar_lea.vmem [#allocation7], %s1132_s25  ;;  %s1194_s7 = scalar_lea.vmem [#allocation8], %s1132_s25 }
  0x7c   : > { %326 = vadd.xlane.f32.xlu1 %v325_v22  ;;  %320 = vadd.xlane.f32.xlu0 %v319_v23  ;;  %v328_v29 = vsel %vm306_vm0, %v305_v25, 0.0  ;;  %v299_v43 = vmul.f32 %v283_v27, %v275_v35  ;;  %v276_v45 = vmul.f32 0.17677669, %v268_v40  ;;  %s638_s4 = sshll.u32 %s958_s16, 8  ;;  %s497_s11 = sshll.u32 %s1194_s7, 4  ;;  %s1218_s11 = int_to_ptr.vmem [resolvable:$true] %s497_s11 }
  0x7d   : > { %v360_v42 = vsel %vm306_vm0, %v338_v38, 0.0  ;;  %v307_v47 = vsel %vm306_vm0, %v298_v44, 0.0  ;;  %v293_v44 = vld [vmem:[%s1180_s22 + $0x6] sm:$0x3]  ;;  %s1216_s5 = scalar_lea.hbm %s1267_s3, %s638_s4  ;;  %s484_s16 = scalar_lea.sflag [#allocation4], %s1129_s10 }
  0x7e   : > { %v310_v46 = vsel %vm306_vm0, %v299_v43, 0.0  ;;  %v300_v48 = vmul.f32 %v284_v26, %v276_v45  ;;  %s837_s26 = scalar_lea.vmem %s1218_s11, 256  ;;  %p1287_p7 = scmp.ne.s32.totalorder %s1276_s23, 0 }
  0x7f   : > { %p838_p13 = scmp.ne.s32.totalorder %s1218_s11, %s837_s26  ;;  %s914_s27 = smov [#allocation8]  }
  0x80   : > { %349 = vadd.xlane.f32.xlu1 %v348_v28  ;;  %329 = vadd.xlane.f32.xlu0 %v328_v29  ;;  %v313_v49 = vsel %vm306_vm0, %v300_v48, 0.0  ;;  %s841_s0 = sshll.u32 %s914_s27, 4  ;;  %s842_s0 = int_to_ptr.vmem [resolvable:$false] %s841_s0 }
  0x81   : > { %p839_p6 = pnand %p838_p13, %p1287_p7  ;;  %s843_s19 = scalar_lea.vmem %s842_s0, 512 }
  0x82   : > { %p844_p12 = scmp.lt.s32.totalorder %s1218_s11, %s842_s0  ;;  %p845_p0 = scmp.lt.s32.totalorder %s843_s19, %s837_s26 }
  0x83   : > { %p840_p9 = pneg %p839_p6 }
  0x84   : > { %355 = vadd.xlane.f32.xlu1 %v354_v36  ;;  %352 = vadd.xlane.f32.xlu0 %v351_v37  ;;  %p846_p8 = por %p845_p0, %p844_p12 }
  0x86   : > { %p847_p10 = pnand %p846_p8, %p840_p9 }
  0x88   : > { %361 = vadd.xlane.f32.xlu1 %v360_v42  ;;  %358 = vadd.xlane.f32.xlu0 %v357_v41  ;;  %v1183_v42 = vld [vmem:[%s1180_s22] sm:$0x3] }
  0x8c   : > { %311 = vadd.xlane.f32.xlu1 %v310_v46  ;;  %308 = vadd.xlane.f32.xlu0 %v307_v47 }
  0x90   : > { %314 = vadd.xlane.f32.xlu0 %v313_v49 }
 0x105   : > { %v324_v50 = vpop.xlane.xlu1 %323  ;;  %v318_v51 = vpop.xlane.xlu0 %317 }
 0x109   : > { %v327_v52 = vpop.xlane.xlu1 %326  ;;  %v321_v53 = vpop.xlane.xlu0 %320 }
 0x10d   : > { %v350_v54 = vpop.xlane.xlu1 %349  ;;  %v330_v55 = vpop.xlane.xlu0 %329 }
 0x10e   : > { %v374_v56 = vmax.f32 %v318_v51, %v350_v54 }
 0x110   : > { %v382_v57 = vsub.f32 %v318_v51, %v374_v56  ;;  %v406_v58 = vsub.f32 %v350_v54, %v374_v56  ;;  %v292_v54 = vld [vmem:[%s1180_s22 + $0x4] sm:$0x3]  ;;  %v294_v56 = vld [vmem:[%s1180_s22 + $0x8] sm:$0x3] }
 0x111   : > { %v356_v59 = vpop.xlane.xlu1 %355  ;;  %v353_v60 = vpop.xlane.xlu0 %352 }
 0x112   : > { %v393_v61 = vmul.f32 1.442695, %v382_v57  ;;  %v417_v62 = vmul.f32 1.442695, %v406_v58  ;;  %v376_v63 = vmax.f32 %v324_v50, %v356_v59  ;;  %v375_v0 = vmax.f32 %v321_v53, %v353_v60  ;;  %v291_v57 = vld [vmem:[%s1180_s22 + $0x2] sm:$0x3] }
 0x114   : > { %699 = vpow2.f32 %v393_v61  ;;  %v384_v1 = vsub.f32 %v324_v50, %v376_v63  ;;  %v408_v2 = vsub.f32 %v356_v59, %v376_v63  ;;  %v383_v3 = vsub.f32 %v321_v53, %v375_v0 }
 0x115   : > { %701 = vpow2.f32 %v417_v62  ;;  %v407_v4 = vsub.f32 %v353_v60, %v375_v0  ;;  %v362_v5 = vpop.xlane.xlu1 %361  ;;  %v359_v6 = vpop.xlane.xlu0 %358 }
 0x116   : > { %v397_v7 = vmul.f32 1.442695, %v384_v1  ;;  %v421_v8 = vmul.f32 1.442695, %v408_v2  ;;  %v395_v9 = vmul.f32 1.442695, %v383_v3  ;;  %v378_v10 = vmax.f32 %v330_v55, %v362_v5 }
 0x117   : > { %v419_v11 = vmul.f32 1.442695, %v407_v4  ;;  %v377_v12 = vmax.f32 %v327_v52, %v359_v6  ;;  %v297_v1 = vld [vmem:[%s1180_s22 + $0xe] sm:$0x3] }
 0x118   : > { %703 = vpow2.f32 %v397_v7  ;;  %v386_v13 = vsub.f32 %v330_v55, %v378_v10  ;;  %v410_v14 = vsub.f32 %v362_v5, %v378_v10 }
 0x119   : > { %705 = vpow2.f32 %v421_v8  ;;  %v385_v15 = vsub.f32 %v327_v52, %v377_v12  ;;  %v409_v16 = vsub.f32 %v359_v6, %v377_v12  ;;  %v312_v17 = vpop.xlane.xlu1 %311  ;;  %v309_v18 = vpop.xlane.xlu0 %308  ;;  %v295_v52 = vld [vmem:[%s1180_s22 + $0xa] sm:$0x3]  ;;  %v296_v8 = vld [vmem:[%s1180_s22 + $0xc] sm:$0x3] }
 0x11a   : > { %707 = vpow2.f32 %v395_v9  ;;  %v401_v19 = vmul.f32 1.442695, %v386_v13  ;;  %v425_v20 = vmul.f32 1.442695, %v410_v14  ;;  %v380_v21 = vsub.f32 %v312_v17, %v312_v17 }
 0x11b   : > { %709 = vpow2.f32 %v419_v11  ;;  %v399_v22 = vmul.f32 1.442695, %v385_v15  ;;  %v423_v23 = vmul.f32 1.442695, %v409_v16  ;;  %v404_v24 = vsub.f32 -inf, %v312_v17 }
 0x11c   : > { %711 = vpow2.f32 %v401_v19  ;;  %v389_v25 = vmul.f32 1.442695, %v380_v21  ;;  %v379_v26 = vsub.f32 %v309_v18, %v309_v18  ;;  %v403_v27 = vsub.f32 -inf, %v309_v18 }
 0x11d   : > { %713 = vpow2.f32 %v425_v20  ;;  %v413_v28 = vmul.f32 1.442695, %v404_v24  ;;  %v315_v29 = vpop.xlane.xlu0 %314 }
 0x11e   : > { %v700_v30 = vpop.eup %699  ;;  %715 = vpow2.f32 %v399_v22  ;;  %v381_v31 = vsub.f32 %v315_v29, %v315_v29  ;;  %v387_v33 = vmul.f32 1.442695, %v379_v26  ;;  %v405_v34 = vsub.f32 -inf, %v315_v29 }
 0x11f   : > { %v702_v32 = vpop.eup %701  ;;  %717 = vpow2.f32 %v423_v23  ;;  %v411_v36 = vmul.f32 1.442695, %v403_v27  ;;  %v430_v50 = vmul.f32 %v700_v30, %v293_v44 }
 0x120   : > { %v438_v35 = vadd.f32 %v702_v32, %v700_v30  ;;  %719 = vpow2.f32 %v389_v25  ;;  %v391_v37 = vmul.f32 1.442695, %v381_v31  ;;  %v415_v40 = vmul.f32 1.442695, %v405_v34 }
 0x121   : > { %721 = vpow2.f32 %v413_v28  ;;  %v446_v49 = vmul.f32 %v702_v32, %v1183_v42 }
 0x122   : > { %v704_v38 = vpop.eup %703  ;;  %723 = vrcp.f32 %v438_v35 }
 0x123   : > { %v706_v39 = vpop.eup %705  ;;  %725 = vpow2.f32 %v387_v33  ;;  %v432_v61 = vmul.f32 %v704_v38, %v295_v52  ;;  %v454_v62 = vadd.f32 %v446_v49, %v430_v50 }
 0x124   : > { %v708_v41 = vpop.eup %707  ;;  %v440_v43 = vadd.f32 %v706_v39, %v704_v38  ;;  %727 = vpow2.f32 %v411_v36  ;;  %v448_v63 = vmul.f32 %v706_v39, %v292_v54 }
 0x125   : > { %v710_v45 = vpop.eup %709  ;;  %729 = vpow2.f32 %v391_v37  ;;  %v431_v2 = vmul.f32 %v708_v41, %v294_v56 }
 0x126   : > { %v712_v46 = vpop.eup %711  ;;  %731 = vrcp.f32 %v440_v43  ;;  %v439_v47 = vadd.f32 %v710_v45, %v708_v41  ;;  %v447_v3 = vmul.f32 %v710_v45, %v291_v57  ;;  %v456_v13 = vadd.f32 %v448_v63, %v432_v61 }
 0x127   : > { %v714_v48 = vpop.eup %713  ;;  %733 = vpow2.f32 %v415_v40  ;;  %v434_v10 = vmul.f32 %v712_v46, %v297_v1 }
 0x128   : > { %v716_v51 = vpop.eup %715  ;;  %735 = vrcp.f32 %v439_v47  ;;  %v442_v53 = vadd.f32 %v714_v48, %v712_v46  ;;  %v450_v11 = vmul.f32 %v714_v48, %v294_v56  ;;  %v455_v15 = vadd.f32 %v447_v3, %v431_v2 }
 0x129   : > { %v718_v55 = vpop.eup %717  ;;  %v433_v17 = vmul.f32 %v716_v51, %v296_v8 }
 0x12a   : > { %v720_v58 = vpop.eup %719  ;;  %737 = vrcp.f32 %v442_v53  ;;  %v441_v59 = vadd.f32 %v718_v55, %v716_v51  ;;  %v449_v18 = vmul.f32 %v718_v55, %v293_v44  ;;  %v458_v22 = vadd.f32 %v450_v11, %v434_v10 }
 0x12b   : > { %v722_v60 = vpop.eup %721  ;;  %v428_v24 = vmul.f32 %v720_v58, %v291_v57 }
 0x12c   : > { %v724_v0 = vpop.eup %723  ;;  %739 = vrcp.f32 %v441_v59  ;;  %v436_v4 = vadd.f32 %v722_v60, %v720_v58  ;;  %v444_v25 = vmul.f32 0.0, %v722_v60  ;;  %v457_v28 = vadd.f32 %v449_v18, %v433_v17 }
 0x12d   : > { %v726_v5 = vpop.eup %725  ;;  %v470_v6 = vmul.f32 %v724_v0, %v454_v62 }
 0x12e   : > { %v728_v7 = vpop.eup %727  ;;  %741 = vrcp.f32 %v436_v4  ;;  %v427_v30 = vmul.f32 %v726_v5, %v1183_v42  ;;  %v452_v33 = vadd.f32 %v444_v25, %v428_v24 }
 0x12f   : > { %v730_v9 = vpop.eup %729  ;;  %478 = vst.msk [vmem:[%s1194_s7 + $0x6] sm:$0x3] %vm306_vm0, %v470_v6  ;;  %v435_v12 = vadd.f32 %v728_v7, %v726_v5  ;;  %v443_v31 = vmul.f32 0.0, %v728_v7 }
 0x130   : > { %v732_v14 = vpop.eup %731  ;;  %v429_v36 = vmul.f32 %v730_v9, %v292_v54 }
 0x131   : > { %v734_v16 = vpop.eup %733  ;;  %743 = vrcp.f32 %v435_v12  ;;  %v472_v19 = vmul.f32 %v732_v14, %v456_v13  ;;  %v451_v38 = vadd.f32 %v443_v31, %v427_v30 }
 0x132   : > { %v736_v20 = vpop.eup %735  ;;  %v437_v21 = vadd.f32 %v734_v16, %v730_v9  ;;  %v445_v37 = vmul.f32 0.0, %v734_v16 }
 0x133   : > { %v471_v23 = vmul.f32 %v736_v20, %v455_v15  ;;  %480 = vst.msk [vmem:[%s1194_s7 + $0xa] sm:$0x3] %vm306_vm0, %v472_v19 }
 0x134   : > { %v738_v26 = vpop.eup %737  ;;  %745 = vrcp.f32 %v437_v21  ;;  %v453_v41 = vadd.f32 %v445_v37, %v429_v36 }
 0x135   : > { %v474_v27 = vmul.f32 %v738_v26, %v458_v22  ;;  %479 = vst.msk [vmem:[%s1194_s7 + $0x8] sm:$0x3] %vm306_vm0, %v471_v23 }
 0x136   : > { %v740_v29 = vpop.eup %739 }
 0x137   : > { %482 = vst.msk [vmem:[%s1194_s7 + $0xe] sm:$0x3] %vm306_vm0, %v474_v27  ;;  %v473_v32 = vmul.f32 %v740_v29, %v457_v28 }
 0x138   : > { %v742_v34 = vpop.eup %741 }
 0x139   : > { %481 = vst.msk [vmem:[%s1194_s7 + $0xc] sm:$0x3] %vm306_vm0, %v473_v32  ;;  %v468_v35 = vmul.f32 %v742_v34, %v452_v33 }
 0x13b   : > { %v744_v39 = vpop.eup %743  ;;  %476 = vst.msk [vmem:[%s1194_s7 + $0x2] sm:$0x3] %vm306_vm0, %v468_v35 }
 0x13c   : > { %v467_v40 = vmul.f32 %v744_v39, %v451_v38 }
 0x13e   : > { %v746_v42 = vpop.eup %745  ;;  %475 = vst.msk [vmem:[%s1194_s7] sm:$0x3] %vm306_vm0, %v467_v40 }
 0x13f   : > { %v469_v43 = vmul.f32 %v746_v42, %v453_v41 }
 0x141   : > { %477 = vst.msk [vmem:[%s1194_s7 + $0x4] sm:$0x3] %vm306_vm0, %v469_v43 }
 0x142   : > { %850 = shalt.err (!%p847_p10)
}
 0x143   : > { %s851_s20 = scalar_lea.hbm %s1216_s5, 256  ;;  %s855_s9 = scalar_lea.hbm %s1267_s3, 512 }
 0x144   : > { %p852_p11 = scmp.ne.s32.totalorder %s1216_s5, %s851_s20  ;;  %p856_p5 = scmp.lt.u32.totalorder %s1216_s5, %s1267_s3 }
 0x145   : > { %p857_p2 = scmp.lt.u32.totalorder %s855_s9, %s851_s20  ;;  %p859_p13 = scmp.lt.u32.totalorder %s851_s20, %s1216_s5 }
 0x146   : > { %p853_p4 = pnand %p852_p11, %p1287_p7 }
 0x147   : > { %p858_p1 = por %p857_p2, %p856_p5 }
 0x148   : > { %p854_p3 = pneg %p853_p4 }
 0x149   : > { %p860_p6 = por %p859_p13, %p858_p1 }
 0x14b   : > { %p861_p9 = pnand %p860_p6, %p854_p3 }
 0x14d   : > { %864 = shalt.err (!%p861_p9)
}
 0x14e   : > { %s915_s17 = smov 32   ;;  %s916_s22 = smov 2  }
 0x14f   : > { %645 = dma.vmem_to_hbm [thread:$0]  (%p1287_p7), %s1218_s11, 256, %s1216_s5, %s484_s16, %s915_s17, %s915_s17, %s916_s22  }
 0x150 PF: > { %s512_s7 = sand.u32 1, %s895_s12   ;;  %p1288_p12 = scmp.ne.s32.totalorder %s1277_s24, 0 }
 0x151   : > { %p1289_p0 = scmp.ge.s32.totalorder %s907_s15, 2  ;;  %s513_s4 = scalar_lea.sflag [#allocation4], %s512_s7 }
 0x153   : > { %p658_p8 = pnand %p1289_p0, %p1288_p12 }
 0x155   : > { %890 = dma.done.wait (!%p658_p8), %s513_s4, 256  }
 0x156   : > { %892 = vsyncadd (!%p658_p8), %s513_s4, 4294967040  ;;  %p19_p10 = scmp.ge.s32.totalorder %s962_s18, 4   ;;  %s1290_s12 = smov %s899_s13 }
 0x157   : > { %s1291_s13 = smov %s903_s14  ;;  %s1292_s14 = smov %s974_s21 }
 0x158   : > { %s1293_s15 = smov %s962_s18  ;;  %21 = sbr.rel (!%p19_p10) target bundleno = 9 (0x9), region = 101 }
 0x15f   :  { %518 = vsyncpa [#allocation3], 1 }
 0x160   :  { %520 = vsyncpa [#allocation3 + $0x1], 1 }
 0x161   :  { %521 = vsyncpa [#allocation6], 1 }
 0x162   :  { %523 = vsyncpa [#allocation6 + $0x1], 1 }
 0x163   :  { %524 = vsyncpa [#allocation4], 1 }
 0x164   :  { %526 = vsyncpa [#allocation4 + $0x1], 1 }

</bundles_post_ra>
